<compile_context>
chip_gen: v6e
topology: v6e:2x2x1
jax: 0.10.0
libtpu: 0.0.40
codegen_flags: <defaults>
</compile_context>

<pallas_src>
import jax
import jax.numpy as jnp
from jax.experimental import pallas as pl
from jax.experimental.pallas import tpu as pltpu


def residual_layer_kernel(x_ref, w1_ref, b1_ref, w2_ref, b2_ref, out_ref):
    x = x_ref[...]                                           # [TM, Fin] f32
    mxu_dtype = w1_ref.dtype                                 # f32 or bf16 operands

    # linear1 + ReLU  -> [TM, Fout]   (f32 accumulation on the MXU)
    h = jnp.dot(x.astype(mxu_dtype), w1_ref[...],
                preferred_element_type=jnp.float32) + b1_ref[...]
    h = jnp.maximum(h, 0.0)

    # linear2 + bias + residual + ReLU -> [TM, Fin]
    y = jnp.dot(h.astype(mxu_dtype), w2_ref[...],
                preferred_element_type=jnp.float32) + b2_ref[...]
    out_ref[...] = jnp.maximum(y + x, 0.0)


def _round_up(a, b):
    return ((a + b - 1) // b) * b


def _vmem_limit_bytes(tm, fin, fout, w_itemsize):
    weights = 2 * fin * fout * w_itemsize + (fin + fout) * 4   # single-buffered residents
    io = 2 * (2 * tm * fin * 4)                                # x + out, double-buffered
    interm = tm * fout * 4                                     # h intermediate
    need = weights + io + interm
    return int(min(max(2 * need, 4 << 20) + (4 << 20), 112 << 20))


def residual_layer_forward(x, W1, b1, W2, b2, *, tm_max=512, param_dtype=None):
    N, Fin = x.shape
    Fout = W1.shape[1]
    assert W1.shape == (Fin, Fout) and W2.shape == (Fout, Fin)
    assert b1.shape == (1, Fout) and b2.shape == (1, Fin)
    assert Fin % 128 == 0 and Fout % 128 == 0, "feature dims must be lane-dense (x128)"

    x = x.astype(jnp.float32)
    b1 = b1.astype(jnp.float32)
    b2 = b2.astype(jnp.float32)
    if param_dtype is not None:
        W1 = W1.astype(param_dtype)
        W2 = W2.astype(param_dtype)

    # Row tile: as large as possible up to tm_max (fewer ~0.35us grid steps).
    n_pad = _round_up(N, 128)
    tm = min(tm_max, n_pad)
    grid_n = pl.cdiv(n_pad, tm)
    if grid_n > 1 and grid_n % 2 == 1:
        grid_n += 1                       # even grid -> balanced across v7x's 2 TCs
    n_pad = grid_n * tm
    if n_pad != N:
        x_in = jnp.zeros((n_pad, Fin), jnp.float32).at[:N, :].set(x)
    else:
        x_in = x

    vmem_limit = _vmem_limit_bytes(tm, Fin, Fout, jnp.dtype(W1.dtype).itemsize)

    def resident(shape):
        # Constant index_map => DMA'd once; single-buffer to halve resident VMEM.
        return pl.BlockSpec(shape, lambda i: (0, 0), pipeline_mode=pl.Buffered(1))

    out = pl.pallas_call(
        residual_layer_kernel,
        out_shape=jax.ShapeDtypeStruct((n_pad, Fin), jnp.float32),
        grid=(grid_n,),
        in_specs=[
            pl.BlockSpec((tm, Fin), lambda i: (i, 0)),   # x row tile (streamed)
            resident((Fin, Fout)),                        # W1
            resident((1, Fout)),                          # b1 (lane-major row)
            resident((Fout, Fin)),                        # W2
            resident((1, Fin)),                           # b2 (lane-major row)
        ],
        out_specs=pl.BlockSpec((tm, Fin), lambda i: (i, 0)),
        compiler_params=pltpu.CompilerParams(
            dimension_semantics=("parallel",),            # 2 TCs on v7x
            vmem_limit_bytes=vmem_limit),
    )(x_in, W1, b1, W2, b2)
    return out[:N]


def reference_forward(x, W1, b1, W2, b2):
    h = jnp.maximum(x @ W1 + b1, 0.0)
    y = h @ W2 + b2 + x
    return jnp.maximum(y, 0.0)


def linear_init(key, fan_in, fan_out):
    # PyTorch nn.Linear default init: U(-1/sqrt(fan_in), 1/sqrt(fan_in)).
    kw, kb = jax.random.split(key)
    limit = 1.0 / (fan_in ** 0.5)
    W = jax.random.uniform(kw, (fan_in, fan_out), jnp.float32, -limit, limit)
    b = jax.random.uniform(kb, (1, fan_out), jnp.float32, -limit, limit)
    return W, b


if __name__ == "__main__":
    # Small but lane-dense shapes: feature dims multiples of 128.
    N, in_features, out_features = 256, 128, 256

    key = jax.random.PRNGKey(0)
    k_x, k_l1, k_l2 = jax.random.split(key, 3)

    x = jax.random.normal(k_x, (N, in_features), jnp.float32)
    W1, b1 = linear_init(k_l1, in_features, out_features)   # linear1
    W2, b2 = linear_init(k_l2, out_features, in_features)   # linear2

    ref = reference_forward(x, W1, b1, W2, b2)

    # 1) f32 path, tile-aligned rows, tight tolerance.
    out = jax.block_until_ready(residual_layer_forward(x, W1, b1, W2, b2))
    assert out.shape == (N, in_features)
    assert jnp.allclose(out, ref, atol=1e-4, rtol=1e-4), "f32 mismatch vs reference"

    # 2) bf16-weight path + non-tile-aligned row count (exercises padding/slicing);
    #    f32 accumulation, so only input-quantization error -> relaxed tolerance.
    N2 = 300
    x2 = jax.random.normal(k_x, (N2, in_features), jnp.float32)
    ref2 = reference_forward(x2, W1, b1, W2, b2)
    out2 = jax.block_until_ready(
        residual_layer_forward(x2, W1, b1, W2, b2, param_dtype=jnp.bfloat16))
    assert out2.shape == (N2, in_features)
    assert jnp.allclose(out2, ref2, atol=5e-2, rtol=5e-2), "bf16 mismatch vs reference"

    print("KERNEL_OK")
</pallas_src>

<mosaic_0001>
module attributes {stable_mosaic.version = 11 : i64} {
  func.func @residual_layer_kernel(%arg0: i32, %arg1: memref<256x128xf32, #tpu.memory_space<vmem>>, %arg2: memref<128x256xf32, #tpu.memory_space<vmem>>, %arg3: memref<1x256xf32, #tpu.memory_space<vmem>>, %arg4: memref<256x128xf32, #tpu.memory_space<vmem>>, %arg5: memref<1x128xf32, #tpu.memory_space<vmem>>, %arg6: memref<256x128xf32, #tpu.memory_space<vmem>>) attributes {dimension_semantics = [#tpu.dimension_semantics<parallel>], iteration_bounds = array<i64: 1>, scalar_prefetch = 0 : i64, scratch_operands = 0 : i64, tpu.core_type = #tpu.core_type<tc>, window_params = [{transform_indices = @transform_0, window_bounds = array<i64: 256, 128>}, {pipeline_mode = #tpu.pipeline_mode<synchronous>, transform_indices = @transform_1, window_bounds = array<i64: 128, 256>}, {pipeline_mode = #tpu.pipeline_mode<synchronous>, transform_indices = @transform_2, window_bounds = array<i64: 1, 256>}, {pipeline_mode = #tpu.pipeline_mode<synchronous>, transform_indices = @transform_3, window_bounds = array<i64: 256, 128>}, {pipeline_mode = #tpu.pipeline_mode<synchronous>, transform_indices = @transform_4, window_bounds = array<i64: 1, 128>}, {transform_indices = @transform_5, window_bounds = array<i64: 256, 128>}]} {
    %c0 = arith.constant 0 : index
    %c0_0 = arith.constant 0 : index
    %0 = vector.load %arg1[%c0, %c0_0] : memref<256x128xf32, #tpu.memory_space<vmem>>, vector<256x128xf32>
    %c0_1 = arith.constant 0 : index
    %c0_2 = arith.constant 0 : index
    %1 = vector.load %arg2[%c0_1, %c0_2] : memref<128x256xf32, #tpu.memory_space<vmem>>, vector<128x256xf32>
    %cst = arith.constant dense<0.000000e+00> : vector<256x256xf32>
    %2 = tpu.matmul %0, %1, %cst {dimension_numbers = #tpu.dot_dimension_numbers<[1], [0], [0], [1], [0, 0, 1, 1], [], []>} : vector<256x128xf32>, vector<128x256xf32>, vector<256x256xf32> -> vector<256x256xf32>
    %c0_3 = arith.constant 0 : index
    %c0_4 = arith.constant 0 : index
    %3 = vector.load %arg3[%c0_3, %c0_4] : memref<1x256xf32, #tpu.memory_space<vmem>>, vector<1x256xf32>
    %4 = vector.broadcast %3 : vector<1x256xf32> to vector<256x256xf32>
    %5 = arith.addf %2, %4 : vector<256x256xf32>
    %cst_5 = arith.constant 0.000000e+00 : f32
    %6 = vector.broadcast %cst_5 : f32 to vector<256x256xf32>
    %7 = arith.maximumf %5, %6 : vector<256x256xf32>
    %c0_6 = arith.constant 0 : index
    %c0_7 = arith.constant 0 : index
    %8 = vector.load %arg4[%c0_6, %c0_7] : memref<256x128xf32, #tpu.memory_space<vmem>>, vector<256x128xf32>
    %cst_8 = arith.constant dense<0.000000e+00> : vector<256x128xf32>
    %9 = tpu.matmul %7, %8, %cst_8 {dimension_numbers = #tpu.dot_dimension_numbers<[1], [0], [0], [1], [0, 0, 1, 1], [], []>} : vector<256x256xf32>, vector<256x128xf32>, vector<256x128xf32> -> vector<256x128xf32>
    %c0_9 = arith.constant 0 : index
    %c0_10 = arith.constant 0 : index
    %10 = vector.load %arg5[%c0_9, %c0_10] : memref<1x128xf32, #tpu.memory_space<vmem>>, vector<1x128xf32>
    %11 = vector.broadcast %10 : vector<1x128xf32> to vector<256x128xf32>
    %12 = arith.addf %9, %11 : vector<256x128xf32>
    %13 = arith.addf %12, %0 : vector<256x128xf32>
    %cst_11 = arith.constant 0.000000e+00 : f32
    %14 = vector.broadcast %cst_11 : f32 to vector<256x128xf32>
    %15 = arith.maximumf %13, %14 : vector<256x128xf32>
    %c0_12 = arith.constant 0 : index
    %c0_13 = arith.constant 0 : index
    %16 = vector.load %arg6[%c0_12, %c0_13] : memref<256x128xf32, #tpu.memory_space<vmem>>, vector<256x128xf32>
    tpu.vector_store %arg6[%c0_12, %c0_13], %15 {strides = array<i32>} : memref<256x128xf32, #tpu.memory_space<vmem>>, vector<256x128xf32>,
    return
  }
  func.func @transform_0(%arg0: i32) -> (i32, i32) {
    %c0_i32 = arith.constant 0 : i32
    %c0_i32_0 = arith.constant 0 : i32
    return %arg0, %c0_i32 : i32, i32
  }
  func.func @transform_1(%arg0: i32) -> (i32, i32) {
    %c0_i32 = arith.constant 0 : i32
    %c0_i32_0 = arith.constant 0 : i32
    %c0_i32_1 = arith.constant 0 : i32
    return %c0_i32, %c0_i32_0 : i32, i32
  }
  func.func @transform_2(%arg0: i32) -> (i32, i32) {
    %c0_i32 = arith.constant 0 : i32
    %c0_i32_0 = arith.constant 0 : i32
    %c0_i32_1 = arith.constant 0 : i32
    return %c0_i32, %c0_i32_0 : i32, i32
  }
  func.func @transform_3(%arg0: i32) -> (i32, i32) {
    %c0_i32 = arith.constant 0 : i32
    %c0_i32_0 = arith.constant 0 : i32
    %c0_i32_1 = arith.constant 0 : i32
    return %c0_i32, %c0_i32_0 : i32, i32
  }
  func.func @transform_4(%arg0: i32) -> (i32, i32) {
    %c0_i32 = arith.constant 0 : i32
    %c0_i32_0 = arith.constant 0 : i32
    %c0_i32_1 = arith.constant 0 : i32
    return %c0_i32, %c0_i32_0 : i32, i32
  }
  func.func @transform_5(%arg0: i32) -> (i32, i32) {
    %c0_i32 = arith.constant 0 : i32
    %c0_i32_0 = arith.constant 0 : i32
    return %arg0, %c0_i32 : i32, i32
  }
}

</mosaic_0001>

<bundles_post_ra>
// kernel: tpu_custom_call.1
= control target key start
LH: loop header
LB: loop body
LE: loop exit
PB: predicated region body
PF: predicated region fallthrough
CT: control target
= control target key end

     0   :  { %10 = vsyncpa [#allocation3], 0  ;;  %s1384_s0 = inlined_call_operand.hbm [shape: f32[256,128], index: 0, kind: input, shape index: {}]   ;;  %s1385_s1 = inlined_call_operand.hbm [shape: f32[128,256], index: 1, kind: input, shape index: {}]   ;;  %s1386_s2 = inlined_call_operand.vmem [shape: f32[1,256], index: 2, kind: input, shape index: {}]   ;;  %s1387_s3 = inlined_call_operand.hbm [shape: f32[256,128], index: 3, kind: input, shape index: {}]   ;;  %s1388_s4 = inlined_call_operand.vmem [shape: f32[1,128], index: 4, kind: input, shape index: {}]   ;;  %s1389_s5 = inlined_call_operand.hbm [shape: f32[256,128], index: 5, kind: output, shape index: {}]  }
   0x1   :  { %11 = vsyncpa [#allocation6], 0 }
   0x2   :  { %12 = vsyncpa [#allocation4], 0  ;;  %s1000_s18 = smov [#allocation5]  }
   0x3   :  { %s30_s19 = sshll.u32 %s1000_s18, 4  ;;  %s31_s19 = int_to_ptr.vmem [resolvable:$true] %s30_s19 }
   0x4   :  { %s922_s20 = scalar_lea.vmem %s31_s19, 4096  ;;  %p927_p1 = scmp.lt.s32.totalorder %s31_s19, %s31_s19 }
   0x5   :  { %p923_p0 = scmp.ne.s32.totalorder %s31_s19, %s922_s20  ;;  %p928_p2 = scmp.lt.s32.totalorder %s922_s20, %s922_s20 }
   0x7   :  { %p929_p3 = por %p928_p2, %p927_p1 }
   0x9   :  { %p930_p4 = pnand %p929_p3, %p923_p0 }
   0xb   :  { %933 = shalt.err (!%p930_p4)
}
   0xc   :  { %s1001_s21 = smov 256   ;;  %s1002_s22 = smov 16  }
   0xd   :  { %36 = dma.hbm_to_vmem [thread:$0]  %s1385_s1, 4096, %s31_s19, [#allocation6], %s1001_s21, %s1001_s21, %s1002_s22  }
   0xe   :  { %s1003_s25 = smov [#allocation2]  }
   0xf   :  { %s18_s26 = sshll.u32 %s1003_s25, 4  ;;  %s19_s26 = int_to_ptr.vmem [resolvable:$true] %s18_s26 }
  0x10   :  { %s942_s27 = scalar_lea.vmem %s19_s26, 4096  ;;  %p947_p6 = scmp.lt.s32.totalorder %s19_s26, %s19_s26 }
  0x11   :  { %p943_p5 = scmp.ne.s32.totalorder %s19_s26, %s942_s27  ;;  %p948_p7 = scmp.lt.s32.totalorder %s942_s27, %s942_s27 }
  0x13   :  { %p949_p8 = por %p948_p7, %p947_p6 }
  0x15   :  { %p950_p9 = pnand %p949_p8, %p943_p5 }
  0x17   :  { %953 = shalt.err (!%p950_p9)
}
  0x18   :  { %s1004_s28 = smov 128   ;;  %s1005_s29 = smov 8  }
  0x19   :  { %24 = dma.hbm_to_vmem [thread:$0]  %s1384_s0, 4096, %s19_s26, [#allocation3], %s1004_s28, %s1004_s28, %s1005_s29  }
  0x1a   :  { %s1006_s1 = smov [#allocation7]  }
  0x1b   :  { %s44_s7 = sshll.u32 %s1006_s1, 4  ;;  %s45_s7 = int_to_ptr.vmem [resolvable:$true] %s44_s7 }
  0x1c   :  { %s962_s8 = scalar_lea.vmem %s45_s7, 4096  ;;  %p967_p11 = scmp.lt.s32.totalorder %s45_s7, %s45_s7 }
  0x1d   :  { %p963_p10 = scmp.ne.s32.totalorder %s45_s7, %s962_s8  ;;  %p968_p12 = scmp.lt.s32.totalorder %s962_s8, %s962_s8 }
  0x1f   :  { %p969_p13 = por %p968_p12, %p967_p11 }
  0x21   :  { %p970_p0 = pnand %p969_p13, %p963_p10 }
  0x23   :  { %973 = shalt.err (!%p970_p0)
}
  0x24   :  { %50 = dma.hbm_to_vmem [thread:$0]  %s1387_s3, 4096, %s45_s7, [#allocation6], %s1004_s28, %s1004_s28, %s1005_s29  }
  0x25   :  { %994 = dma.done.wait [#allocation3], 4096  }
  0x26   :  { %995 = vsyncadd [#allocation3], 4294963200 }
  0x27   :  { %996 = dma.done.wait [#allocation6], 8192  }
  0x28   :  { %997 = vsyncadd [#allocation6], 4294959104  ;;  %v1007_v0 = vmov 0.0   ;;  %v125_v1 = vld [vmem:[#allocation5 + $0xf8] sm:$0xff]  ;;  %v124_v2 = vld [vmem:[#allocation5 + $0xf0] sm:$0xff] }
  0x29   :  { %202 = vmatprep.mubr.f32.mxu0 %v1007_v0  ;;  %838 = vmatprep.subr.mxu1 %v1007_v0  ;;  %v123_v3 = vld [vmem:[#allocation5 + $0xe8] sm:$0xff]  ;;  %v122_v4 = vld [vmem:[#allocation5 + $0xe0] sm:$0xff]  ;;  %v121_v5 = vld [vmem:[#allocation5 + $0xd8] sm:$0xff] }
  0x2a   :  { %138 = vmatprep.subr.mxu0 %v125_v1  ;;  %v120_v6 = vld [vmem:[#allocation5 + $0xd0] sm:$0xff]  ;;  %v119_v7 = vld [vmem:[#allocation5 + $0xc8] sm:$0xff]  ;;  %v118_v8 = vld [vmem:[#allocation5 + $0xc0] sm:$0xff] }
  0x2b   :  { %139 = vmatpush1.msra.mxu0 %v124_v2  ;;  %v117_v9 = vld [vmem:[#allocation5 + $0xb8] sm:$0xff]  ;;  %v116_v10 = vld [vmem:[#allocation5 + $0xb0] sm:$0xff]  ;;  %v115_v11 = vld [vmem:[#allocation5 + $0xa8] sm:$0xff] }
  0x2c   :  { %140 = vmatprep.subr.mxu0 %v123_v3  ;;  %v114_v12 = vld [vmem:[#allocation5 + $0xa0] sm:$0xff]  ;;  %v113_v13 = vld [vmem:[#allocation5 + $0x98] sm:$0xff]  ;;  %v112_v14 = vld [vmem:[#allocation5 + $0x90] sm:$0xff] }
  0x2d   :  { %141 = vmatpush1.msra.mxu0 %v122_v4  ;;  %v111_v15 = vld [vmem:[#allocation5 + $0x88] sm:$0xff]  ;;  %v110_v16 = vld [vmem:[#allocation5 + $0x80] sm:$0xff]  ;;  %v109_v17 = vld [vmem:[#allocation5 + $0x78] sm:$0xff] }
  0x2e   :  { %142 = vmatprep.subr.mxu0 %v121_v5  ;;  %v108_v18 = vld [vmem:[#allocation5 + $0x70] sm:$0xff]  ;;  %v107_v19 = vld [vmem:[#allocation5 + $0x68] sm:$0xff]  ;;  %v106_v20 = vld [vmem:[#allocation5 + $0x60] sm:$0xff] }
  0x2f   :  { %143 = vmatpush1.msra.mxu0 %v120_v6  ;;  %v105_v21 = vld [vmem:[#allocation5 + $0x58] sm:$0xff]  ;;  %v104_v22 = vld [vmem:[#allocation5 + $0x50] sm:$0xff]  ;;  %v103_v23 = vld [vmem:[#allocation5 + $0x48] sm:$0xff] }
  0x30   :  { %144 = vmatprep.subr.mxu0 %v119_v7  ;;  %v102_v24 = vld [vmem:[#allocation5 + $0x40] sm:$0xff]  ;;  %v101_v25 = vld [vmem:[#allocation5 + $0x38] sm:$0xff]  ;;  %v100_v26 = vld [vmem:[#allocation5 + $0x30] sm:$0xff] }
  0x31   :  { %145 = vmatpush1.msra.mxu0 %v118_v8  ;;  %v99_v27 = vld [vmem:[#allocation5 + $0x28] sm:$0xff]  ;;  %v98_v28 = vld [vmem:[#allocation5 + $0x20] sm:$0xff]  ;;  %v97_v29 = vld [vmem:[#allocation5 + $0x18] sm:$0xff] }
  0x32   :  { %146 = vmatprep.subr.mxu0 %v117_v9  ;;  %v96_v30 = vld [vmem:[#allocation5 + $0x10] sm:$0xff]  ;;  %v95_v31 = vld [vmem:[#allocation5 + $0x8] sm:$0xff]  ;;  %v94_v32 = vld [vmem:[#allocation5] sm:$0xff] }
  0x33   :  { %147 = vmatpush1.msra.mxu0 %v116_v10  ;;  %v474_v33 = vld [vmem:[#allocation7 + $0x78] sm:$0xff]  ;;  %v62_v34 = vld [vmem:[#allocation2] sm:$0xff]  ;;  %v473_v35 = vld [vmem:[#allocation7 + $0x70] sm:$0xff] }
  0x34   :  { %148 = vmatprep.subr.mxu0 %v115_v11  ;;  %870 = vmatpush1.msra.mxu1 %v474_v33  ;;  %v63_v36 = vld [vmem:[#allocation2 + $0x8] sm:$0xff]  ;;  %v471_v38 = vld [vmem:[#allocation7 + $0x60] sm:$0xff]  ;;  %v64_v39 = vld [vmem:[#allocation2 + $0x10] sm:$0xff] }
  0x35   :  { %149 = vmatpush1.msra.mxu0 %v114_v12  ;;  %839 = vmatprep.subr.mxu1 %v1007_v0  ;;  %v472_v37 = vld [vmem:[#allocation7 + $0x68] sm:$0xff]  ;;  %v470_v40 = vld [vmem:[#allocation7 + $0x58] sm:$0xff]  ;;  %v469_v41 = vld [vmem:[#allocation7 + $0x50] sm:$0xff] }
  0x36   :  { %150 = vmatprep.subr.mxu0 %v113_v13  ;;  %871 = vmatpush1.msra.mxu1 %v473_v35  ;;  %v1067_v42 = vld [vmem:[#allocation2 + $0x18] sm:$0xff]  ;;  %v468_v43 = vld [vmem:[#allocation7 + $0x48] sm:$0xff]  ;;  %v467_v44 = vld [vmem:[#allocation7 + $0x40] sm:$0xff] }
  0x37   :  { %151 = vmatpush1.msra.mxu0 %v112_v14  ;;  %840 = vmatprep.subr.mxu1 %v1007_v0  ;;  %v1074_v45 = vld [vmem:[#allocation2 + $0x20] sm:$0xff]  ;;  %v466_v46 = vld [vmem:[#allocation7 + $0x38] sm:$0xff]  ;;  %v465_v47 = vld [vmem:[#allocation7 + $0x30] sm:$0xff] }
  0x38   :  { %152 = vmatprep.subr.mxu0 %v111_v15  ;;  %872 = vmatpush1.msra.mxu1 %v472_v37  ;;  %v1081_v48 = vld [vmem:[#allocation2 + $0x28] sm:$0xff]  ;;  %v463_v50 = vld [vmem:[#allocation7 + $0x20] sm:$0xff]  ;;  %v1088_v51 = vld [vmem:[#allocation2 + $0x30] sm:$0xff] }
  0x39   :  { %153 = vmatpush1.msra.mxu0 %v110_v16  ;;  %841 = vmatprep.subr.mxu1 %v1007_v0  ;;  %v464_v49 = vld [vmem:[#allocation7 + $0x28] sm:$0xff]  ;;  %v462_v52 = vld [vmem:[#allocation7 + $0x18] sm:$0xff]  ;;  %v461_v53 = vld [vmem:[#allocation7 + $0x10] sm:$0xff] }
  0x3a   :  { %154 = vmatprep.subr.mxu0 %v109_v17  ;;  %873 = vmatpush1.msra.mxu1 %v471_v38  ;;  %v1095_v54 = vld [vmem:[#allocation2 + $0x38] sm:$0xff]  ;;  %v460_v55 = vld [vmem:[#allocation7 + $0x8] sm:$0xff]  ;;  %v459_v56 = vld [vmem:[#allocation7] sm:$0xff] }
  0x3b   :  { %155 = vmatpush1.msra.mxu0 %v108_v18  ;;  %842 = vmatprep.subr.mxu1 %v1007_v0  ;;  %v1102_v57 = vld [vmem:[#allocation2 + $0x40] sm:$0xff]  ;;  %v490_v58 = vld [vmem:[#allocation7 + $0xf8] sm:$0xff]  ;;  %v489_v59 = vld [vmem:[#allocation7 + $0xf0] sm:$0xff] }
  0x3c   :  { %156 = vmatprep.subr.mxu0 %v107_v19  ;;  %874 = vmatpush1.msra.mxu1 %v470_v40  ;;  %v1109_v60 = vld [vmem:[#allocation2 + $0x48] sm:$0xff]  ;;  %v487_v62 = vld [vmem:[#allocation7 + $0xe0] sm:$0xff]  ;;  %v1116_v63 = vld [vmem:[#allocation2 + $0x50] sm:$0xff] }
  0x3d   :  { %157 = vmatpush1.msra.mxu0 %v106_v20  ;;  %843 = vmatprep.subr.mxu1 %v1007_v0  ;;  %v488_v61 = vld [vmem:[#allocation7 + $0xe8] sm:$0xff]  ;;  %v486_v1 = vld [vmem:[#allocation7 + $0xd8] sm:$0xff]  ;;  %v485_v3 = vld [vmem:[#allocation7 + $0xd0] sm:$0xff] }
  0x3e   :  { %158 = vmatprep.subr.mxu0 %v105_v21  ;;  %875 = vmatpush1.msra.mxu1 %v469_v41  ;;  %v1123_v2 = vld [vmem:[#allocation2 + $0x58] sm:$0xff]  ;;  %v1129_v4 = vld [vmem:[#allocation7 + $0xc8] sm:$0xff]  ;;  %v1132_v5 = vld [vmem:[#allocation2 + $0x60] sm:$0xff] }
  0x3f   :  { %159 = vmatpush1.msra.mxu0 %v104_v22  ;;  %844 = vmatprep.subr.mxu1 %v1007_v0  ;;  %v483_v6 = vld [vmem:[#allocation7 + $0xc0] sm:$0xff]  ;;  %v1140_v7 = vld [vmem:[#allocation2 + $0x68] sm:$0xff]  ;;  %v482_v8 = vld [vmem:[#allocation7 + $0xb8] sm:$0xff] }
  0x40   :  { %160 = vmatprep.subr.mxu0 %v103_v23  ;;  %876 = vmatpush1.msra.mxu1 %v468_v43  ;;  %v481_v9 = vld [vmem:[#allocation7 + $0xb0] sm:$0xff]  ;;  %v480_v11 = vld [vmem:[#allocation7 + $0xa8] sm:$0xff]  ;;  %v1154_v12 = vld [vmem:[#allocation2 + $0x78] sm:$0xff] }
  0x41   :  { %161 = vmatpush1.msra.mxu0 %v102_v24  ;;  %845 = vmatprep.subr.mxu1 %v1007_v0  ;;  %v1147_v10 = vld [vmem:[#allocation2 + $0x70] sm:$0xff]  ;;  %v479_v13 = vld [vmem:[#allocation7 + $0xa0] sm:$0xff]  ;;  %v478_v15 = vld [vmem:[#allocation7 + $0x98] sm:$0xff] }
  0x42   :  { %162 = vmatprep.subr.mxu0 %v101_v25  ;;  %877 = vmatpush1.msra.mxu1 %v467_v44  ;;  %v1161_v14 = vld [vmem:[#allocation2 + $0x80] sm:$0xff]  ;;  %v1168_v16 = vld [vmem:[#allocation2 + $0x88] sm:$0xff]  ;;  %v477_v17 = vld [vmem:[#allocation7 + $0x90] sm:$0xff] }
  0x43   :  { %163 = vmatpush1.msra.mxu0 %v100_v26  ;;  %846 = vmatprep.subr.mxu1 %v1007_v0  ;;  %v476_v18 = vld [vmem:[#allocation7 + $0x88] sm:$0xff]  ;;  %v1175_v19 = vld [vmem:[#allocation2 + $0x90] sm:$0xff]  ;;  %v475_v20 = vld [vmem:[#allocation7 + $0x80] sm:$0xff] }
  0x44   :  { %164 = vmatprep.subr.mxu0 %v99_v27  ;;  %878 = vmatpush1.msra.mxu1 %v466_v46  ;;  %v1183_v21 = vld [vmem:[#allocation2 + $0x98] sm:$0xff]  ;;  %v1188_v22 = vld [vmem:[#allocation2 + $0xa0] sm:$0xff]  ;;  %v1194_v23 = vld [vmem:[#allocation2 + $0xa8] sm:$0xff] }
  0x45   :  { %165 = vmatpush1.msra.mxu0 %v98_v28  ;;  %847 = vmatprep.subr.mxu1 %v1007_v0  ;;  %v1200_v24 = vld [vmem:[#allocation2 + $0xb0] sm:$0xff]  ;;  %v1206_v25 = vld [vmem:[#allocation2 + $0xb8] sm:$0xff]  ;;  %v1210_v26 = vld [vmem:[#allocation2 + $0xc0] sm:$0xff] }
  0x46   :  { %166 = vmatprep.subr.mxu0 %v97_v29  ;;  %879 = vmatpush1.msra.mxu1 %v465_v47  ;;  %v1214_v27 = vld [vmem:[#allocation2 + $0xc8] sm:$0xff]  ;;  %v1218_v28 = vld [vmem:[#allocation2 + $0xd0] sm:$0xff]  ;;  %v1222_v29 = vld [vmem:[#allocation2 + $0xd8] sm:$0xff] }
  0x47   :  { %167 = vmatpush1.msra.mxu0 %v96_v30  ;;  %848 = vmatprep.subr.mxu1 %v1007_v0  ;;  %v1226_v30 = vld [vmem:[#allocation2 + $0xe0] sm:$0xff] }
  0x48   :  { %168 = vmatprep.subr.mxu0 %v95_v31  ;;  %880 = vmatpush1.msra.mxu1 %v464_v49  ;;  %v1230_v31 = vld [vmem:[#allocation2 + $0xe8] sm:$0xff] }
  0x49   :  { %169 = vmatpush1.msra.mxu0 %v94_v32  ;;  %849 = vmatprep.subr.mxu1 %v1007_v0  ;;  %v1234_v32 = vld [vmem:[#allocation2 + $0xf0] sm:$0xff] }
  0x4a   :  { %203 = vmatmul.mubr.f32.vlgmr.msra.gmra.mxu0 %v62_v34  ;;  %498 = vmatprep.subr.mxu0 %v1007_v0  ;;  %v128_v34 = vlaneseq }
  0x4b   :  { %208 = vmatprep.mubr.f32.mxu0 %v1007_v0  ;;  %499 = vmatpush1.msra.mxu0 %v474_v33  ;;  %v1238_v33 = vld [vmem:[#allocation2 + $0xf8] sm:$0xff] }
  0x4c   :  { %500 = vmatprep.subr.mxu0 %v1007_v0  ;;  %881 = vmatpush1.msra.mxu1 %v463_v50 }
  0x4d   :  { %501 = vmatpush1.msra.mxu0 %v473_v35  ;;  %850 = vmatprep.subr.mxu1 %v1007_v0  ;;  %v129_v35 = vshrl.u32 %v128_v34, 7 }
  0x4e   :  { %209 = vmatmul.mubr.f32.gmra.mxu0 %v63_v36  ;;  %502 = vmatprep.subr.mxu0 %v1007_v0 }
  0x4f   :  { %214 = vmatprep.mubr.f32.mxu0 %v1007_v0  ;;  %503 = vmatpush1.msra.mxu0 %v472_v37  ;;  %v130_v36 = vsub.s32 0, %v129_v35  ;;  %v126_v37 = vld [vmem:[%s1386_s2] sm:$0x3] }
  0x50   :  { %504 = vmatprep.subr.mxu0 %v1007_v0  ;;  %882 = vmatpush1.msra.mxu1 %v462_v52 }
  0x51   :  { %505 = vmatpush1.msra.mxu0 %v471_v38  ;;  %851 = vmatprep.subr.mxu1 %v1007_v0  ;;  %v134_v38 = vsub.s32 1, %v129_v35 }
  0x52   :  { %215 = vmatmul.mubr.f32.gmra.mxu0 %v64_v39  ;;  %506 = vmatprep.subr.mxu0 %v1007_v0  ;;  %v1244_v39 = vrot.slane %v126_v37, %v130_v36 }
  0x53   :  { %220 = vmatprep.mubr.f32.mxu0 %v1007_v0  ;;  %507 = vmatpush1.msra.mxu0 %v470_v40  ;;  %v1246_v40 = vrot.slane %v126_v37, %v134_v38 }
  0x54   :  { %508 = vmatprep.subr.mxu0 %v1007_v0  ;;  %883 = vmatpush1.msra.mxu1 %v461_v53 }
  0x55   :  { %509 = vmatpush1.msra.mxu0 %v469_v41  ;;  %852 = vmatprep.subr.mxu1 %v1007_v0 }
  0x56   :  { %221 = vmatmul.mubr.f32.gmra.mxu0 %v1067_v42  ;;  %510 = vmatprep.subr.mxu0 %v1007_v0 }
  0x57   :  { %226 = vmatprep.mubr.f32.mxu0 %v1007_v0  ;;  %511 = vmatpush1.msra.mxu0 %v468_v43 }
  0x58   :  { %512 = vmatprep.subr.mxu0 %v1007_v0  ;;  %884 = vmatpush1.msra.mxu1 %v460_v55 }
  0x59   :  { %513 = vmatpush1.msra.mxu0 %v467_v44  ;;  %853 = vmatprep.subr.mxu1 %v1007_v0 }
  0x5a   :  { %227 = vmatmul.mubr.f32.gmra.mxu0 %v1074_v45  ;;  %514 = vmatprep.subr.mxu0 %v1007_v0 }
  0x5b   :  { %232 = vmatprep.mubr.f32.mxu0 %v1007_v0  ;;  %515 = vmatpush1.msra.mxu0 %v466_v46 }
  0x5c   :  { %516 = vmatprep.subr.mxu0 %v1007_v0  ;;  %885 = vmatpush1.msra.mxu1 %v459_v56 }
  0x5d   :  { %517 = vmatpush1.msra.mxu0 %v465_v47  ;;  %854 = vmatprep.subr.mxu1 %v1007_v0 }
  0x5e   :  { %233 = vmatmul.mubr.f32.gmra.mxu0 %v1081_v48  ;;  %518 = vmatprep.subr.mxu0 %v1007_v0 }
  0x5f   :  { %238 = vmatprep.mubr.f32.mxu0 %v1007_v0  ;;  %519 = vmatpush1.msra.mxu0 %v464_v49 }
  0x60   :  { %520 = vmatprep.subr.mxu0 %v1007_v0  ;;  %886 = vmatpush2.msra.mxu1 %v490_v58 }
  0x61   :  { %521 = vmatpush1.msra.mxu0 %v463_v50  ;;  %855 = vmatprep.subr.mxu1 %v1007_v0 }
  0x62   :  { %239 = vmatmul.mubr.f32.gmra.mxu0 %v1088_v51  ;;  %522 = vmatprep.subr.mxu0 %v1007_v0 }
  0x63   :  { %244 = vmatprep.mubr.f32.mxu0 %v1007_v0  ;;  %523 = vmatpush1.msra.mxu0 %v462_v52 }
  0x64   :  { %524 = vmatprep.subr.mxu0 %v1007_v0  ;;  %887 = vmatpush2.msra.mxu1 %v489_v59 }
  0x65   :  { %525 = vmatpush1.msra.mxu0 %v461_v53  ;;  %856 = vmatprep.subr.mxu1 %v1007_v0 }
  0x66   :  { %245 = vmatmul.mubr.f32.gmra.mxu0 %v1095_v54  ;;  %526 = vmatprep.subr.mxu0 %v1007_v0 }
  0x67   :  { %250 = vmatprep.mubr.f32.mxu0 %v1007_v0  ;;  %527 = vmatpush1.msra.mxu0 %v460_v55 }
  0x68   :  { %528 = vmatprep.subr.mxu0 %v1007_v0  ;;  %888 = vmatpush2.msra.mxu1 %v488_v61 }
  0x69   :  { %529 = vmatpush1.msra.mxu0 %v459_v56  ;;  %857 = vmatprep.subr.mxu1 %v1007_v0 }
  0x6a   :  { %251 = vmatmul.mubr.f32.gmra.mxu0 %v1102_v57  ;;  %530 = vmatprep.subr.mxu0 %v1007_v0 }
  0x6b   :  { %256 = vmatprep.mubr.f32.mxu0 %v1007_v0  ;;  %531 = vmatpush2.msra.mxu0 %v490_v58 }
  0x6c   :  { %532 = vmatprep.subr.mxu0 %v1007_v0  ;;  %889 = vmatpush2.msra.mxu1 %v487_v62 }
  0x6d   :  { %533 = vmatpush2.msra.mxu0 %v489_v59  ;;  %858 = vmatprep.subr.mxu1 %v1007_v0 }
  0x6e   :  { %257 = vmatmul.mubr.f32.gmra.mxu0 %v1109_v60  ;;  %534 = vmatprep.subr.mxu0 %v1007_v0 }
  0x6f   :  { %262 = vmatprep.mubr.f32.mxu0 %v1007_v0  ;;  %535 = vmatpush2.msra.mxu0 %v488_v61 }
  0x70   :  { %536 = vmatprep.subr.mxu0 %v1007_v0  ;;  %890 = vmatpush2.msra.mxu1 %v486_v1 }
  0x71   :  { %537 = vmatpush2.msra.mxu0 %v487_v62  ;;  %859 = vmatprep.subr.mxu1 %v1007_v0 }
  0x72   :  { %263 = vmatmul.mubr.f32.gmra.mxu0 %v1116_v63  ;;  %538 = vmatprep.subr.mxu0 %v1007_v0 }
  0x73   :  { %268 = vmatprep.mubr.f32.mxu0 %v1007_v0  ;;  %539 = vmatpush2.msra.mxu0 %v486_v1 }
  0x74   :  { %540 = vmatprep.subr.mxu0 %v1007_v0  ;;  %891 = vmatpush2.msra.mxu1 %v485_v3 }
  0x75   :  { %541 = vmatpush2.msra.mxu0 %v485_v3  ;;  %860 = vmatprep.subr.mxu1 %v1007_v0 }
  0x76   :  { %269 = vmatmul.mubr.f32.gmra.mxu0 %v1123_v2  ;;  %542 = vmatprep.subr.mxu0 %v1007_v0 }
  0x77   :  { %274 = vmatprep.mubr.f32.mxu0 %v1007_v0  ;;  %543 = vmatpush2.msra.mxu0 %v1129_v4 }
  0x78   :  { %544 = vmatprep.subr.mxu0 %v1007_v0  ;;  %892 = vmatpush2.msra.mxu1 %v1129_v4 }
  0x79   :  { %545 = vmatpush2.msra.mxu0 %v483_v6  ;;  %861 = vmatprep.subr.mxu1 %v1007_v0 }
  0x7a   :  { %275 = vmatmul.mubr.f32.gmra.mxu0 %v1132_v5  ;;  %546 = vmatprep.subr.mxu0 %v1007_v0 }
  0x7b   :  { %280 = vmatprep.mubr.f32.mxu0 %v1007_v0  ;;  %547 = vmatpush2.msra.mxu0 %v482_v8 }
  0x7c   :  { %548 = vmatprep.subr.mxu0 %v1007_v0  ;;  %893 = vmatpush2.msra.mxu1 %v483_v6 }
  0x7d   :  { %549 = vmatpush2.msra.mxu0 %v481_v9  ;;  %862 = vmatprep.subr.mxu1 %v1007_v0 }
  0x7e   :  { %281 = vmatmul.mubr.f32.gmra.mxu0 %v1140_v7  ;;  %550 = vmatprep.subr.mxu0 %v1007_v0 }
  0x7f   :  { %286 = vmatprep.mubr.f32.mxu0 %v1007_v0  ;;  %551 = vmatpush2.msra.mxu0 %v480_v11 }
  0x80   :  { %552 = vmatprep.subr.mxu0 %v1007_v0  ;;  %894 = vmatpush2.msra.mxu1 %v482_v8 }
  0x81   :  { %553 = vmatpush2.msra.mxu0 %v479_v13  ;;  %863 = vmatprep.subr.mxu1 %v1007_v0 }
  0x82   :  { %287 = vmatmul.mubr.f32.gmra.mxu0 %v1147_v10  ;;  %554 = vmatprep.subr.mxu0 %v1007_v0 }
  0x83   :  { %292 = vmatprep.mubr.f32.mxu0 %v1007_v0  ;;  %555 = vmatpush2.msra.mxu0 %v478_v15 }
  0x84   :  { %556 = vmatprep.subr.mxu0 %v1007_v0  ;;  %895 = vmatpush2.msra.mxu1 %v481_v9 }
  0x85   :  { %557 = vmatpush2.msra.mxu0 %v477_v17  ;;  %864 = vmatprep.subr.mxu1 %v1007_v0 }
  0x86   :  { %293 = vmatmul.mubr.f32.gmra.mxu0 %v1154_v12  ;;  %558 = vmatprep.subr.mxu0 %v1007_v0 }
  0x87   :  { %298 = vmatprep.mubr.f32.mxu0 %v1007_v0  ;;  %559 = vmatpush2.msra.mxu0 %v476_v18 }
  0x88   :  { %560 = vmatprep.subr.mxu0 %v1007_v0  ;;  %896 = vmatpush2.msra.mxu1 %v480_v11 }
  0x89   :  { %561 = vmatpush2.msra.mxu0 %v475_v20  ;;  %865 = vmatprep.subr.mxu1 %v1007_v0 }
  0x8a   :  { %299 = vmatmul.mubr.f32.gmra.mxu0 %v1161_v14  ;;  %897 = vmatpush2.msra.mxu1 %v479_v13 }
  0x8b   :  { %304 = vmatprep.mubr.f32.mxu0 %v1007_v0  ;;  %866 = vmatprep.subr.mxu1 %v1007_v0 }
  0x8c   :  { %898 = vmatpush2.msra.mxu1 %v478_v15 }
  0x8d   :  { %867 = vmatprep.subr.mxu1 %v1007_v0 }
  0x8e   :  { %305 = vmatmul.mubr.f32.gmra.mxu0 %v1168_v16  ;;  %899 = vmatpush2.msra.mxu1 %v477_v17 }
  0x8f   :  { %310 = vmatprep.mubr.f32.mxu0 %v1007_v0  ;;  %868 = vmatprep.subr.mxu1 %v1007_v0 }
  0x90   :  { %900 = vmatpush2.msra.mxu1 %v476_v18 }
  0x91   :  { %869 = vmatprep.subr.mxu1 %v1007_v0 }
  0x92   :  { %311 = vmatmul.mubr.f32.gmra.mxu0 %v1175_v19  ;;  %901 = vmatpush2.msra.mxu1 %v475_v20 }
  0x93   :  { %316 = vmatprep.mubr.f32.mxu0 %v1007_v0 }
  0x96   :  { %317 = vmatmul.mubr.f32.gmra.mxu0 %v1183_v21 }
  0x97   :  { %322 = vmatprep.mubr.f32.mxu0 %v1007_v0 }
  0x9a   :  { %323 = vmatmul.mubr.f32.gmra.mxu0 %v1188_v22 }
  0x9b   :  { %328 = vmatprep.mubr.f32.mxu0 %v1007_v0 }
  0x9e   :  { %329 = vmatmul.mubr.f32.gmra.mxu0 %v1194_v23 }
  0x9f   :  { %334 = vmatprep.mubr.f32.mxu0 %v1007_v0 }
  0xa2   :  { %335 = vmatmul.mubr.f32.gmra.mxu0 %v1200_v24 }
  0xa3   :  { %340 = vmatprep.mubr.f32.mxu0 %v1007_v0 }
  0xa6   :  { %341 = vmatmul.mubr.f32.gmra.mxu0 %v1206_v25 }
  0xa7   :  { %346 = vmatprep.mubr.f32.mxu0 %v1007_v0 }
  0xaa   :  { %347 = vmatmul.mubr.f32.gmra.mxu0 %v1210_v26 }
  0xab   :  { %352 = vmatprep.mubr.f32.mxu0 %v1007_v0 }
  0xae   :  { %353 = vmatmul.mubr.f32.gmra.mxu0 %v1214_v27 }
  0xaf   :  { %358 = vmatprep.mubr.f32.mxu0 %v1007_v0 }
  0xb2   :  { %359 = vmatmul.mubr.f32.gmra.mxu0 %v1218_v28 }
  0xb3   :  { %364 = vmatprep.mubr.f32.mxu0 %v1007_v0 }
  0xb6   :  { %365 = vmatmul.mubr.f32.gmra.mxu0 %v1222_v29 }
  0xb7   :  { %370 = vmatprep.mubr.f32.mxu0 %v1007_v0 }
  0xba   :  { %371 = vmatmul.mubr.f32.gmra.mxu0 %v1226_v30 }
  0xbb   :  { %376 = vmatprep.mubr.f32.mxu0 %v1007_v0 }
  0xbe   :  { %377 = vmatmul.mubr.f32.gmra.mxu0 %v1230_v31 }
  0xbf   :  { %382 = vmatprep.mubr.f32.mxu0 %v1007_v0 }
  0xc2   :  { %383 = vmatmul.mubr.f32.gmra.mxu0 %v1234_v32 }
  0xc3   :  { %388 = vmatprep.mubr.f32.mxu0 %v1007_v0 }
  0xc6   :  { %389 = vmatmul.mubr.f32.gmra.mxu0 %v1238_v33 }
 0x10a   :  { %v204_v41 = vpop.f32.mrf.mxu0 }
 0x10b   :  { %v205_v43 = vadd.f32 %v204_v41, %v1244_v39 }
 0x10c   :  { %v206_v0 = vpop.f32.mrf.mxu0 }
 0x10d   :  { %v207_v44 = vadd.f32 %v206_v0, %v1246_v40  ;;  %v395_v49 = vmax.f32 %v205_v43, 0.0 }
 0x10e   :  { %v210_v46 = vpop.f32.mrf.mxu0 }
 0x10f   :  { %v396_v47 = vmax.f32 %v207_v44, 0.0  ;;  %v211_v50 = vadd.f32 %v210_v46, %v1244_v39 }
 0x110   :  { %v212_v52 = vpop.f32.mrf.mxu0 }
 0x111   :  { %v213_v53 = vadd.f32 %v212_v52, %v1246_v40  ;;  %562 = vmatprep.mubr.f32.mxu0 %v396_v47  ;;  %v397_v58 = vmax.f32 %v211_v50, 0.0 }
 0x112   :  { %v216_v55 = vpop.f32.mrf.mxu0  ;;  %563 = vmatmul.mubr.f32.vlgmr.msra.gmra.mxu0 %v395_v49 }
 0x113   :  { %v398_v56 = vmax.f32 %v213_v53, 0.0  ;;  %v217_v59 = vadd.f32 %v216_v55, %v1244_v39 }
 0x114   :  { %v218_v61 = vpop.f32.mrf.mxu0 }
 0x115   :  { %v219_v62 = vadd.f32 %v218_v61, %v1246_v40  ;;  %567 = vmatprep.mubr.f32.mxu0 %v398_v56  ;;  %v399_v4 = vmax.f32 %v217_v59, 0.0 }
 0x116   :  { %v222_v1 = vpop.f32.mrf.mxu0  ;;  %568 = vmatmul.mubr.f32.gmra.mxu0 %v397_v58 }
 0x117   :  { %v400_v3 = vmax.f32 %v219_v62, 0.0  ;;  %v223_v6 = vadd.f32 %v222_v1, %v1244_v39 }
 0x118   :  { %v224_v8 = vpop.f32.mrf.mxu0 }
 0x119   :  { %v225_v9 = vadd.f32 %v224_v8, %v1246_v40  ;;  %572 = vmatprep.mubr.f32.mxu0 %v400_v3  ;;  %v401_v15 = vmax.f32 %v223_v6, 0.0 }
 0x11a   :  { %v228_v11 = vpop.f32.mrf.mxu0  ;;  %573 = vmatmul.mubr.f32.gmra.mxu0 %v399_v4 }
 0x11b   :  { %v402_v13 = vmax.f32 %v225_v9, 0.0  ;;  %v229_v17 = vadd.f32 %v228_v11, %v1244_v39 }
 0x11c   :  { %v230_v18 = vpop.f32.mrf.mxu0 }
 0x11d   :  { %577 = vmatprep.mubr.f32.mxu0 %v402_v13  ;;  %v231_v20 = vadd.f32 %v230_v18, %v1246_v40  ;;  %v403_v36 = vmax.f32 %v229_v17, 0.0 }
 0x11e   :  { %v234_v34 = vpop.f32.mrf.mxu0  ;;  %578 = vmatmul.mubr.f32.gmra.mxu0 %v401_v15 }
 0x11f   :  { %v404_v35 = vmax.f32 %v231_v20, 0.0  ;;  %v235_v37 = vadd.f32 %v234_v34, %v1244_v39 }
 0x120   :  { %v236_v38 = vpop.f32.mrf.mxu0 }
 0x121   :  { %v237_v41 = vadd.f32 %v236_v38, %v1246_v40  ;;  %582 = vmatprep.mubr.f32.mxu1 %v404_v35  ;;  %v405_v44 = vmax.f32 %v235_v37, 0.0 }
 0x122   :  { %v240_v43 = vpop.f32.mrf.mxu0  ;;  %583 = vmatmul.mubr.f32.vlgmr.msra.gmra.mxu1 %v403_v36 }
 0x123   :  { %v406_v0 = vmax.f32 %v237_v41, 0.0  ;;  %v241_v46 = vadd.f32 %v240_v43, %v1244_v39 }
 0x124   :  { %v242_v47 = vpop.f32.mrf.mxu0 }
 0x125   :  { %v243_v49 = vadd.f32 %v242_v47, %v1246_v40  ;;  %587 = vmatprep.mubr.f32.mxu1 %v406_v0  ;;  %v407_v53 = vmax.f32 %v241_v46, 0.0 }
 0x126   :  { %v246_v50 = vpop.f32.mrf.mxu0  ;;  %588 = vmatmul.mubr.f32.gmra.mxu1 %v405_v44 }
 0x127   :  { %v408_v52 = vmax.f32 %v243_v49, 0.0  ;;  %v247_v55 = vadd.f32 %v246_v50, %v1244_v39 }
 0x128   :  { %v248_v56 = vpop.f32.mrf.mxu0 }
 0x129   :  { %v249_v58 = vadd.f32 %v248_v56, %v1246_v40  ;;  %592 = vmatprep.mubr.f32.mxu1 %v408_v52  ;;  %v409_v62 = vmax.f32 %v247_v55, 0.0 }
 0x12a   :  { %v252_v59 = vpop.f32.mrf.mxu0  ;;  %593 = vmatmul.mubr.f32.gmra.mxu1 %v407_v53 }
 0x12b   :  { %v410_v61 = vmax.f32 %v249_v58, 0.0  ;;  %v253_v1 = vadd.f32 %v252_v59, %v1244_v39 }
 0x12c   :  { %v254_v3 = vpop.f32.mrf.mxu0 }
 0x12d   :  { %v255_v4 = vadd.f32 %v254_v3, %v1246_v40  ;;  %597 = vmatprep.mubr.f32.mxu1 %v410_v61  ;;  %v411_v9 = vmax.f32 %v253_v1, 0.0 }
 0x12e   :  { %v258_v6 = vpop.f32.mrf.mxu0  ;;  %598 = vmatmul.mubr.f32.gmra.mxu1 %v409_v62 }
 0x12f   :  { %v412_v8 = vmax.f32 %v255_v4, 0.0  ;;  %v259_v11 = vadd.f32 %v258_v6, %v1244_v39 }
 0x130   :  { %v260_v13 = vpop.f32.mrf.mxu0 }
 0x131   :  { %v261_v15 = vadd.f32 %v260_v13, %v1246_v40  ;;  %602 = vmatprep.mubr.f32.mxu1 %v412_v8  ;;  %v413_v20 = vmax.f32 %v259_v11, 0.0 }
 0x132   :  { %v264_v17 = vpop.f32.mrf.mxu0  ;;  %603 = vmatmul.mubr.f32.gmra.mxu1 %v411_v9 }
 0x133   :  { %v414_v18 = vmax.f32 %v261_v15, 0.0  ;;  %v265_v34 = vadd.f32 %v264_v17, %v1244_v39 }
 0x134   :  { %v266_v35 = vpop.f32.mrf.mxu0 }
 0x135   :  { %v267_v36 = vadd.f32 %v266_v35, %v1246_v40  ;;  %607 = vmatprep.mubr.f32.mxu1 %v414_v18  ;;  %v415_v41 = vmax.f32 %v265_v34, 0.0 }
 0x136   :  { %v270_v37 = vpop.f32.mrf.mxu0  ;;  %608 = vmatmul.mubr.f32.gmra.mxu1 %v413_v20 }
 0x137   :  { %v416_v38 = vmax.f32 %v267_v36, 0.0  ;;  %v271_v43 = vadd.f32 %v270_v37, %v1244_v39 }
 0x138   :  { %v272_v0 = vpop.f32.mrf.mxu0 }
 0x139   :  { %v273_v44 = vadd.f32 %v272_v0, %v1246_v40  ;;  %612 = vmatprep.mubr.f32.mxu1 %v416_v38  ;;  %v417_v49 = vmax.f32 %v271_v43, 0.0 }
 0x13a   :  { %v276_v46 = vpop.f32.mrf.mxu0  ;;  %613 = vmatmul.mubr.f32.gmra.mxu1 %v415_v41 }
 0x13b   :  { %v418_v47 = vmax.f32 %v273_v44, 0.0  ;;  %v277_v50 = vadd.f32 %v276_v46, %v1244_v39 }
 0x13c   :  { %v278_v52 = vpop.f32.mrf.mxu0 }
 0x13d   :  { %v279_v53 = vadd.f32 %v278_v52, %v1246_v40  ;;  %617 = vmatprep.mubr.f32.mxu1 %v418_v47  ;;  %v419_v58 = vmax.f32 %v277_v50, 0.0 }
 0x13e   :  { %v282_v55 = vpop.f32.mrf.mxu0  ;;  %618 = vmatmul.mubr.f32.gmra.mxu1 %v417_v49 }
 0x13f   :  { %v420_v56 = vmax.f32 %v279_v53, 0.0  ;;  %v283_v59 = vadd.f32 %v282_v55, %v1244_v39 }
 0x140   :  { %v284_v61 = vpop.f32.mrf.mxu0 }
 0x141   :  { %v285_v62 = vadd.f32 %v284_v61, %v1246_v40  ;;  %622 = vmatprep.mubr.f32.mxu1 %v420_v56  ;;  %v421_v4 = vmax.f32 %v283_v59, 0.0 }
 0x142   :  { %v288_v1 = vpop.f32.mrf.mxu0  ;;  %623 = vmatmul.mubr.f32.gmra.mxu1 %v419_v58 }
 0x143   :  { %v422_v3 = vmax.f32 %v285_v62, 0.0  ;;  %v289_v6 = vadd.f32 %v288_v1, %v1244_v39 }
 0x144   :  { %v290_v8 = vpop.f32.mrf.mxu0 }
 0x145   :  { %v291_v9 = vadd.f32 %v290_v8, %v1246_v40  ;;  %627 = vmatprep.mubr.f32.mxu1 %v422_v3  ;;  %v423_v15 = vmax.f32 %v289_v6, 0.0 }
 0x146   :  { %v294_v11 = vpop.f32.mrf.mxu0  ;;  %628 = vmatmul.mubr.f32.gmra.mxu1 %v421_v4 }
 0x147   :  { %v424_v13 = vmax.f32 %v291_v9, 0.0  ;;  %v295_v17 = vadd.f32 %v294_v11, %v1244_v39 }
 0x148   :  { %v296_v18 = vpop.f32.mrf.mxu0 }
 0x149   :  { %v297_v20 = vadd.f32 %v296_v18, %v1246_v40  ;;  %632 = vmatprep.mubr.f32.mxu1 %v424_v13  ;;  %v425_v36 = vmax.f32 %v295_v17, 0.0 }
 0x14a   :  { %v300_v34 = vpop.f32.mrf.mxu0  ;;  %633 = vmatmul.mubr.f32.gmra.mxu1 %v423_v15 }
 0x14b   :  { %v426_v35 = vmax.f32 %v297_v20, 0.0  ;;  %v301_v37 = vadd.f32 %v300_v34, %v1244_v39 }
 0x14c   :  { %v302_v38 = vpop.f32.mrf.mxu0 }
 0x14d   :  { %v303_v41 = vadd.f32 %v302_v38, %v1246_v40  ;;  %637 = vmatprep.mubr.f32.mxu1 %v426_v35  ;;  %v427_v44 = vmax.f32 %v301_v37, 0.0 }
 0x14e   :  { %v306_v43 = vpop.f32.mrf.mxu0  ;;  %638 = vmatmul.mubr.f32.gmra.mxu1 %v425_v36 }
 0x14f   :  { %v428_v0 = vmax.f32 %v303_v41, 0.0  ;;  %v307_v46 = vadd.f32 %v306_v43, %v1244_v39 }
 0x150   :  { %v308_v47 = vpop.f32.mrf.mxu0 }
 0x151   :  { %v309_v49 = vadd.f32 %v308_v47, %v1246_v40  ;;  %642 = vmatprep.mubr.f32.mxu1 %v428_v0  ;;  %v429_v53 = vmax.f32 %v307_v46, 0.0 }
 0x152   :  { %v312_v50 = vpop.f32.mrf.mxu0  ;;  %643 = vmatmul.mubr.f32.gmra.mxu1 %v427_v44 }
 0x153   :  { %v430_v52 = vmax.f32 %v309_v49, 0.0  ;;  %v313_v55 = vadd.f32 %v312_v50, %v1244_v39 }
 0x154   :  { %v314_v56 = vpop.f32.mrf.mxu0 }
 0x155   :  { %v315_v58 = vadd.f32 %v314_v56, %v1246_v40  ;;  %647 = vmatprep.mubr.f32.mxu1 %v430_v52  ;;  %v431_v62 = vmax.f32 %v313_v55, 0.0 }
 0x156   :  { %v318_v59 = vpop.f32.mrf.mxu0  ;;  %648 = vmatmul.mubr.f32.gmra.mxu1 %v429_v53 }
 0x157   :  { %v432_v61 = vmax.f32 %v315_v58, 0.0  ;;  %v319_v1 = vadd.f32 %v318_v59, %v1244_v39 }
 0x158   :  { %v320_v3 = vpop.f32.mrf.mxu0 }
 0x159   :  { %v321_v4 = vadd.f32 %v320_v3, %v1246_v40  ;;  %652 = vmatprep.mubr.f32.mxu1 %v432_v61  ;;  %v433_v9 = vmax.f32 %v319_v1, 0.0 }
 0x15a   :  { %v324_v6 = vpop.f32.mrf.mxu0  ;;  %653 = vmatmul.mubr.f32.gmra.mxu1 %v431_v62 }
 0x15b   :  { %v434_v8 = vmax.f32 %v321_v4, 0.0  ;;  %v325_v11 = vadd.f32 %v324_v6, %v1244_v39 }
 0x15c   :  { %v326_v13 = vpop.f32.mrf.mxu0 }
 0x15d   :  { %v327_v15 = vadd.f32 %v326_v13, %v1246_v40  ;;  %657 = vmatprep.mubr.f32.mxu1 %v434_v8  ;;  %v435_v20 = vmax.f32 %v325_v11, 0.0 }
 0x15e   :  { %v330_v17 = vpop.f32.mrf.mxu0  ;;  %658 = vmatmul.mubr.f32.gmra.mxu1 %v433_v9 }
 0x15f   :  { %v436_v18 = vmax.f32 %v327_v15, 0.0  ;;  %v331_v34 = vadd.f32 %v330_v17, %v1244_v39 }
 0x160   :  { %v332_v35 = vpop.f32.mrf.mxu0 }
 0x161   :  { %v333_v36 = vadd.f32 %v332_v35, %v1246_v40  ;;  %662 = vmatprep.mubr.f32.mxu1 %v436_v18  ;;  %v437_v41 = vmax.f32 %v331_v34, 0.0 }
 0x162   :  { %v336_v37 = vpop.f32.mrf.mxu0  ;;  %663 = vmatmul.mubr.f32.gmra.mxu1 %v435_v20 }
 0x163   :  { %v438_v38 = vmax.f32 %v333_v36, 0.0  ;;  %v337_v43 = vadd.f32 %v336_v37, %v1244_v39 }
 0x164   :  { %v338_v0 = vpop.f32.mrf.mxu0 }
 0x165   :  { %v339_v44 = vadd.f32 %v338_v0, %v1246_v40  ;;  %667 = vmatprep.mubr.f32.mxu1 %v438_v38  ;;  %v439_v49 = vmax.f32 %v337_v43, 0.0 }
 0x166   :  { %v342_v46 = vpop.f32.mrf.mxu0  ;;  %668 = vmatmul.mubr.f32.gmra.mxu1 %v437_v41 }
 0x167   :  { %v440_v47 = vmax.f32 %v339_v44, 0.0  ;;  %v343_v50 = vadd.f32 %v342_v46, %v1244_v39 }
 0x168   :  { %v344_v52 = vpop.f32.mrf.mxu0 }
 0x169   :  { %v345_v53 = vadd.f32 %v344_v52, %v1246_v40  ;;  %672 = vmatprep.mubr.f32.mxu1 %v440_v47  ;;  %v441_v58 = vmax.f32 %v343_v50, 0.0 }
 0x16a   :  { %v348_v55 = vpop.f32.mrf.mxu0  ;;  %673 = vmatmul.mubr.f32.gmra.mxu1 %v439_v49 }
 0x16b   :  { %v442_v56 = vmax.f32 %v345_v53, 0.0  ;;  %v349_v59 = vadd.f32 %v348_v55, %v1244_v39 }
 0x16c   :  { %v350_v61 = vpop.f32.mrf.mxu0 }
 0x16d   :  { %v351_v62 = vadd.f32 %v350_v61, %v1246_v40  ;;  %677 = vmatprep.mubr.f32.mxu1 %v442_v56  ;;  %v443_v4 = vmax.f32 %v349_v59, 0.0 }
 0x16e   :  { %v354_v1 = vpop.f32.mrf.mxu0  ;;  %678 = vmatmul.mubr.f32.gmra.mxu1 %v441_v58 }
 0x16f   :  { %v444_v3 = vmax.f32 %v351_v62, 0.0  ;;  %v355_v6 = vadd.f32 %v354_v1, %v1244_v39 }
 0x170   :  { %v356_v8 = vpop.f32.mrf.mxu0 }
 0x171   :  { %v357_v9 = vadd.f32 %v356_v8, %v1246_v40  ;;  %682 = vmatprep.mubr.f32.mxu1 %v444_v3  ;;  %v445_v15 = vmax.f32 %v355_v6, 0.0 }
 0x172   :  { %v360_v11 = vpop.f32.mrf.mxu0  ;;  %683 = vmatmul.mubr.f32.gmra.mxu1 %v443_v4 }
 0x173   :  { %v446_v13 = vmax.f32 %v357_v9, 0.0  ;;  %v361_v17 = vadd.f32 %v360_v11, %v1244_v39 }
 0x174   :  { %v362_v18 = vpop.f32.mrf.mxu0 }
 0x175   :  { %v363_v20 = vadd.f32 %v362_v18, %v1246_v40  ;;  %687 = vmatprep.mubr.f32.mxu1 %v446_v13  ;;  %v447_v36 = vmax.f32 %v361_v17, 0.0 }
 0x176   :  { %v366_v34 = vpop.f32.mrf.mxu0  ;;  %688 = vmatmul.mubr.f32.gmra.mxu1 %v445_v15 }
 0x177   :  { %v448_v35 = vmax.f32 %v363_v20, 0.0  ;;  %v367_v37 = vadd.f32 %v366_v34, %v1244_v39  ;;  %v1315_v20 = vld [vmem:[%s1388_s4] ss:$0 sm:$0xff]  ;;  %s1008_s4 = smov [#allocation8]  }
 0x178   :  { %v368_v38 = vpop.f32.mrf.mxu0  ;;  %s824_s12 = sshll.u32 %s1008_s4, 4  ;;  %s825_s12 = int_to_ptr.vmem [resolvable:$true] %s824_s12 }
 0x179   :  { %v369_v41 = vadd.f32 %v368_v38, %v1246_v40  ;;  %692 = vmatprep.mubr.f32.mxu1 %v448_v35  ;;  %v449_v44 = vmax.f32 %v367_v37, 0.0  ;;  %v911_v37 = vld [vmem:[#allocation2] sm:$0xff]  ;;  %s974_s13 = scalar_lea.vmem %s825_s12, 4096  ;;  %p979_p2 = scmp.lt.s32.totalorder %s825_s12, %s825_s12 }
 0x17a   :  { %v372_v43 = vpop.f32.mrf.mxu0  ;;  %693 = vmatmul.mubr.f32.gmra.mxu1 %v447_v36  ;;  %p975_p1 = scmp.ne.s32.totalorder %s825_s12, %s974_s13  ;;  %p980_p3 = scmp.lt.s32.totalorder %s974_s13, %s974_s13 }
 0x17b   :  { %v450_v0 = vmax.f32 %v369_v41, 0.0  ;;  %v373_v46 = vadd.f32 %v372_v43, %v1244_v39 }
 0x17c   :  { %v374_v47 = vpop.f32.mrf.mxu0  ;;  %p981_p4 = por %p980_p3, %p979_p2 }
 0x17d   :  { %v375_v49 = vadd.f32 %v374_v47, %v1246_v40  ;;  %697 = vmatprep.mubr.f32.mxu1 %v450_v0  ;;  %v451_v53 = vmax.f32 %v373_v46, 0.0  ;;  %v912_v0 = vld [vmem:[#allocation2 + $0x8] sm:$0xff] }
 0x17e   :  { %v378_v50 = vpop.f32.mrf.mxu0  ;;  %698 = vmatmul.mubr.f32.gmra.mxu1 %v449_v44  ;;  %p982_p5 = pnand %p981_p4, %p975_p1 }
 0x17f   :  { %v452_v52 = vmax.f32 %v375_v49, 0.0  ;;  %v379_v55 = vadd.f32 %v378_v50, %v1244_v39 }
 0x180   :  { %v380_v56 = vpop.f32.mrf.mxu0 }
 0x181   :  { %v381_v58 = vadd.f32 %v380_v56, %v1246_v40  ;;  %702 = vmatprep.mubr.f32.mxu1 %v452_v52  ;;  %v453_v62 = vmax.f32 %v379_v55, 0.0  ;;  %v913_v52 = vld [vmem:[#allocation2 + $0x10] sm:$0xff] }
 0x182   :  { %v384_v59 = vpop.f32.mrf.mxu0  ;;  %703 = vmatmul.mubr.f32.gmra.mxu1 %v451_v53 }
 0x183   :  { %v454_v61 = vmax.f32 %v381_v58, 0.0  ;;  %v385_v1 = vadd.f32 %v384_v59, %v1244_v39 }
 0x184   :  { %v386_v3 = vpop.f32.mrf.mxu0 }
 0x185   :  { %v387_v4 = vadd.f32 %v386_v3, %v1246_v40  ;;  %707 = vmatprep.mubr.f32.mxu1 %v454_v61  ;;  %v455_v9 = vmax.f32 %v385_v1, 0.0 }
 0x186   :  { %v390_v6 = vpop.f32.mrf.mxu0  ;;  %708 = vmatmul.mubr.f32.gmra.mxu1 %v453_v62 }
 0x187   :  { %v456_v8 = vmax.f32 %v387_v4, 0.0  ;;  %v391_v11 = vadd.f32 %v390_v6, %v1244_v39 }
 0x188   :  { %v392_v13 = vpop.f32.mrf.mxu0 }
 0x189   :  { %v393_v15 = vadd.f32 %v392_v13, %v1246_v40  ;;  %712 = vmatprep.mubr.f32.mxu1 %v456_v8  ;;  %v457_v18 = vmax.f32 %v391_v11, 0.0 }
 0x18a   :  { %713 = vmatmul.mubr.f32.gmra.mxu1 %v455_v9 }
 0x18b   :  { %v458_v17 = vmax.f32 %v393_v15, 0.0 }
 0x18d   :  { %717 = vmatprep.mubr.f32.mxu1 %v458_v17 }
 0x18e   :  { %718 = vmatmul.mubr.f32.gmra.mxu1 %v457_v18 }
 0x1d2   :  { %v564_v34 = vpop.f32.mrf.mxu0 }
 0x1d3   :  { %v565_v35 = vadd.f32 %v1315_v20, %v564_v34 }
 0x1d4   :  { %v566_v36 = vpop.f32.mrf.mxu0 }
 0x1d5   :  { %v723_v39 = vadd.f32 %v911_v37, %v565_v35 }
 0x1d6   :  { %v569_v38 = vpop.f32.mrf.mxu0 }
 0x1d7   :  { %v755_v41 = vmax.f32 %v723_v39, 0.0  ;;  %v570_v40 = vadd.f32 %v1315_v20, %v569_v38 }
 0x1d8   :  { %v571_v43 = vpop.f32.mrf.mxu0 }
 0x1d9   :  { %787 = vst [vmem:[#allocation8] sm:$0xff] %v755_v41  ;;  %v724_v44 = vadd.f32 %v912_v0, %v570_v40 }
 0x1da   :  { %v574_v46 = vpop.f32.mrf.mxu0 }
 0x1db   :  { %v756_v47 = vmax.f32 %v724_v44, 0.0  ;;  %v575_v49 = vadd.f32 %v1315_v20, %v574_v46 }
 0x1dc   :  { %v576_v50 = vpop.f32.mrf.mxu0 }
 0x1dd   :  { %788 = vst [vmem:[#allocation8 + $0x8] sm:$0xff] %v756_v47  ;;  %v725_v53 = vadd.f32 %v913_v52, %v575_v49 }
 0x1de   :  { %v579_v55 = vpop.f32.mrf.mxu0 }
 0x1df   :  { %v757_v56 = vmax.f32 %v725_v53, 0.0  ;;  %v580_v58 = vadd.f32 %v1315_v20, %v579_v55 }
 0x1e0   :  { %v581_v59 = vpop.f32.mrf.mxu0 }
 0x1e1   :  { %789 = vst [vmem:[#allocation8 + $0x10] sm:$0xff] %v757_v56  ;;  %v726_v61 = vadd.f32 %v580_v58, %v1067_v42 }
 0x1e2   :  { %v584_v62 = vpop.f32.mrf.mxu1 }
 0x1e3   :  { %v758_v1 = vmax.f32 %v726_v61, 0.0  ;;  %v585_v3 = vadd.f32 %v1315_v20, %v584_v62 }
 0x1e4   :  { %v586_v4 = vpop.f32.mrf.mxu1 }
 0x1e5   :  { %790 = vst [vmem:[#allocation8 + $0x18] sm:$0xff] %v758_v1  ;;  %v727_v6 = vadd.f32 %v585_v3, %v1074_v45 }
 0x1e6   :  { %v589_v8 = vpop.f32.mrf.mxu1 }
 0x1e7   :  { %v759_v9 = vmax.f32 %v727_v6, 0.0  ;;  %v590_v11 = vadd.f32 %v1315_v20, %v589_v8 }
 0x1e8   :  { %v591_v13 = vpop.f32.mrf.mxu1 }
 0x1e9   :  { %791 = vst [vmem:[#allocation8 + $0x20] sm:$0xff] %v759_v9  ;;  %v728_v15 = vadd.f32 %v590_v11, %v1081_v48 }
 0x1ea   :  { %v594_v17 = vpop.f32.mrf.mxu1 }
 0x1eb   :  { %v760_v18 = vmax.f32 %v728_v15, 0.0  ;;  %v595_v42 = vadd.f32 %v1315_v20, %v594_v17 }
 0x1ec   :  { %v596_v34 = vpop.f32.mrf.mxu1 }
 0x1ed   :  { %792 = vst [vmem:[#allocation8 + $0x28] sm:$0xff] %v760_v18  ;;  %v729_v35 = vadd.f32 %v595_v42, %v1088_v51 }
 0x1ee   :  { %v599_v36 = vpop.f32.mrf.mxu1 }
 0x1ef   :  { %v761_v37 = vmax.f32 %v729_v35, 0.0  ;;  %v600_v45 = vadd.f32 %v1315_v20, %v599_v36 }
 0x1f0   :  { %v601_v39 = vpop.f32.mrf.mxu1 }
 0x1f1   :  { %793 = vst [vmem:[#allocation8 + $0x30] sm:$0xff] %v761_v37  ;;  %v730_v38 = vadd.f32 %v600_v45, %v1095_v54 }
 0x1f2   :  { %v604_v41 = vpop.f32.mrf.mxu1 }
 0x1f3   :  { %v762_v40 = vmax.f32 %v730_v38, 0.0  ;;  %v605_v48 = vadd.f32 %v1315_v20, %v604_v41 }
 0x1f4   :  { %v606_v43 = vpop.f32.mrf.mxu1 }
 0x1f5   :  { %794 = vst [vmem:[#allocation8 + $0x38] sm:$0xff] %v762_v40  ;;  %v731_v0 = vadd.f32 %v605_v48, %v1102_v57 }
 0x1f6   :  { %v609_v44 = vpop.f32.mrf.mxu1 }
 0x1f7   :  { %v763_v46 = vmax.f32 %v731_v0, 0.0  ;;  %v610_v51 = vadd.f32 %v1315_v20, %v609_v44 }
 0x1f8   :  { %v611_v47 = vpop.f32.mrf.mxu1 }
 0x1f9   :  { %795 = vst [vmem:[#allocation8 + $0x40] sm:$0xff] %v763_v46  ;;  %v732_v49 = vadd.f32 %v610_v51, %v1109_v60 }
 0x1fa   :  { %v614_v50 = vpop.f32.mrf.mxu1 }
 0x1fb   :  { %v764_v52 = vmax.f32 %v732_v49, 0.0  ;;  %v615_v54 = vadd.f32 %v1315_v20, %v614_v50 }
 0x1fc   :  { %v616_v53 = vpop.f32.mrf.mxu1 }
 0x1fd   :  { %796 = vst [vmem:[#allocation8 + $0x48] sm:$0xff] %v764_v52  ;;  %v733_v55 = vadd.f32 %v615_v54, %v1116_v63 }
 0x1fe   :  { %v619_v56 = vpop.f32.mrf.mxu1 }
 0x1ff   :  { %v765_v58 = vmax.f32 %v733_v55, 0.0  ;;  %v620_v57 = vadd.f32 %v1315_v20, %v619_v56 }
 0x200   :  { %v621_v59 = vpop.f32.mrf.mxu1 }
 0x201   :  { %797 = vst [vmem:[#allocation8 + $0x50] sm:$0xff] %v765_v58  ;;  %v734_v61 = vadd.f32 %v620_v57, %v1123_v2 }
 0x202   :  { %v624_v62 = vpop.f32.mrf.mxu1 }
 0x203   :  { %v766_v1 = vmax.f32 %v734_v61, 0.0  ;;  %v625_v60 = vadd.f32 %v1315_v20, %v624_v62 }
 0x204   :  { %v626_v3 = vpop.f32.mrf.mxu1 }
 0x205   :  { %798 = vst [vmem:[#allocation8 + $0x58] sm:$0xff] %v766_v1  ;;  %v735_v4 = vadd.f32 %v625_v60, %v1132_v5 }
 0x206   :  { %v629_v6 = vpop.f32.mrf.mxu1 }
 0x207   :  { %v767_v8 = vmax.f32 %v735_v4, 0.0  ;;  %v630_v63 = vadd.f32 %v1315_v20, %v629_v6 }
 0x208   :  { %v631_v9 = vpop.f32.mrf.mxu1 }
 0x209   :  { %799 = vst [vmem:[#allocation8 + $0x60] sm:$0xff] %v767_v8  ;;  %v736_v11 = vadd.f32 %v630_v63, %v1140_v7 }
 0x20a   :  { %v634_v13 = vpop.f32.mrf.mxu1 }
 0x20b   :  { %v768_v15 = vmax.f32 %v736_v11, 0.0  ;;  %v635_v2 = vadd.f32 %v1315_v20, %v634_v13 }
 0x20c   :  { %v636_v17 = vpop.f32.mrf.mxu1 }
 0x20d   :  { %800 = vst [vmem:[#allocation8 + $0x68] sm:$0xff] %v768_v15  ;;  %v737_v18 = vadd.f32 %v635_v2, %v1147_v10 }
 0x20e   :  { %v639_v42 = vpop.f32.mrf.mxu1 }
 0x20f   :  { %v769_v34 = vmax.f32 %v737_v18, 0.0  ;;  %v640_v5 = vadd.f32 %v1315_v20, %v639_v42 }
 0x210   :  { %v641_v35 = vpop.f32.mrf.mxu1 }
 0x211   :  { %801 = vst [vmem:[#allocation8 + $0x70] sm:$0xff] %v769_v34  ;;  %v738_v36 = vadd.f32 %v640_v5, %v1154_v12 }
 0x212   :  { %v644_v37 = vpop.f32.mrf.mxu1 }
 0x213   :  { %v770_v45 = vmax.f32 %v738_v36, 0.0  ;;  %v645_v7 = vadd.f32 %v1315_v20, %v644_v37 }
 0x214   :  { %v646_v39 = vpop.f32.mrf.mxu1 }
 0x215   :  { %802 = vst [vmem:[#allocation8 + $0x78] sm:$0xff] %v770_v45  ;;  %v739_v38 = vadd.f32 %v645_v7, %v1161_v14 }
 0x216   :  { %v649_v41 = vpop.f32.mrf.mxu1 }
 0x217   :  { %v771_v40 = vmax.f32 %v739_v38, 0.0  ;;  %v650_v10 = vadd.f32 %v1315_v20, %v649_v41 }
 0x218   :  { %v651_v48 = vpop.f32.mrf.mxu1 }
 0x219   :  { %803 = vst [vmem:[#allocation8 + $0x80] sm:$0xff] %v771_v40  ;;  %v740_v43 = vadd.f32 %v650_v10, %v1168_v16 }
 0x21a   :  { %v654_v0 = vpop.f32.mrf.mxu1 }
 0x21b   :  { %v772_v44 = vmax.f32 %v740_v43, 0.0  ;;  %v655_v12 = vadd.f32 %v1315_v20, %v654_v0 }
 0x21c   :  { %v656_v46 = vpop.f32.mrf.mxu1 }
 0x21d   :  { %804 = vst [vmem:[#allocation8 + $0x88] sm:$0xff] %v772_v44  ;;  %v741_v51 = vadd.f32 %v655_v12, %v1175_v19 }
 0x21e   :  { %v659_v47 = vpop.f32.mrf.mxu1 }
 0x21f   :  { %v773_v49 = vmax.f32 %v741_v51, 0.0  ;;  %v660_v14 = vadd.f32 %v1315_v20, %v659_v47 }
 0x220   :  { %v661_v50 = vpop.f32.mrf.mxu1 }
 0x221   :  { %805 = vst [vmem:[#allocation8 + $0x90] sm:$0xff] %v773_v49  ;;  %v742_v52 = vadd.f32 %v660_v14, %v1183_v21 }
 0x222   :  { %v664_v54 = vpop.f32.mrf.mxu1 }
 0x223   :  { %v774_v53 = vmax.f32 %v742_v52, 0.0  ;;  %v665_v16 = vadd.f32 %v1315_v20, %v664_v54 }
 0x224   :  { %v666_v55 = vpop.f32.mrf.mxu1 }
 0x225   :  { %806 = vst [vmem:[#allocation8 + $0x98] sm:$0xff] %v774_v53  ;;  %v743_v56 = vadd.f32 %v665_v16, %v1188_v22 }
 0x226   :  { %v669_v58 = vpop.f32.mrf.mxu1 }
 0x227   :  { %v775_v57 = vmax.f32 %v743_v56, 0.0  ;;  %v670_v19 = vadd.f32 %v1315_v20, %v669_v58 }
 0x228   :  { %v671_v59 = vpop.f32.mrf.mxu1 }
 0x229   :  { %807 = vst [vmem:[#allocation8 + $0xa0] sm:$0xff] %v775_v57  ;;  %v744_v61 = vadd.f32 %v670_v19, %v1194_v23 }
 0x22a   :  { %v674_v62 = vpop.f32.mrf.mxu1 }
 0x22b   :  { %v776_v1 = vmax.f32 %v744_v61, 0.0  ;;  %v675_v21 = vadd.f32 %v1315_v20, %v674_v62 }
 0x22c   :  { %v676_v60 = vpop.f32.mrf.mxu1 }
 0x22d   :  { %808 = vst [vmem:[#allocation8 + $0xa8] sm:$0xff] %v776_v1  ;;  %v745_v3 = vadd.f32 %v675_v21, %v1200_v24 }
 0x22e   :  { %v679_v4 = vpop.f32.mrf.mxu1 }
 0x22f   :  { %v777_v6 = vmax.f32 %v745_v3, 0.0  ;;  %v680_v22 = vadd.f32 %v1315_v20, %v679_v4 }
 0x230   :  { %v681_v8 = vpop.f32.mrf.mxu1 }
 0x231   :  { %809 = vst [vmem:[#allocation8 + $0xb0] sm:$0xff] %v777_v6  ;;  %v746_v63 = vadd.f32 %v680_v22, %v1206_v25 }
 0x232   :  { %v684_v9 = vpop.f32.mrf.mxu1 }
 0x233   :  { %v778_v11 = vmax.f32 %v746_v63, 0.0  ;;  %v685_v23 = vadd.f32 %v1315_v20, %v684_v9 }
 0x234   :  { %v686_v13 = vpop.f32.mrf.mxu1 }
 0x235   :  { %810 = vst [vmem:[#allocation8 + $0xb8] sm:$0xff] %v778_v11  ;;  %v747_v15 = vadd.f32 %v685_v23, %v1210_v26 }
 0x236   :  { %v689_v2 = vpop.f32.mrf.mxu1 }
 0x237   :  { %v779_v17 = vmax.f32 %v747_v15, 0.0  ;;  %v690_v24 = vadd.f32 %v1315_v20, %v689_v2 }
 0x238   :  { %v691_v18 = vpop.f32.mrf.mxu1 }
 0x239   :  { %811 = vst [vmem:[#allocation8 + $0xc0] sm:$0xff] %v779_v17  ;;  %v748_v42 = vadd.f32 %v690_v24, %v1214_v27 }
 0x23a   :  { %v694_v34 = vpop.f32.mrf.mxu1 }
 0x23b   :  { %v780_v5 = vmax.f32 %v748_v42, 0.0  ;;  %v695_v25 = vadd.f32 %v1315_v20, %v694_v34 }
 0x23c   :  { %v696_v35 = vpop.f32.mrf.mxu1 }
 0x23d   :  { %812 = vst [vmem:[#allocation8 + $0xc8] sm:$0xff] %v780_v5  ;;  %v749_v36 = vadd.f32 %v695_v25, %v1218_v28 }
 0x23e   :  { %v699_v37 = vpop.f32.mrf.mxu1 }
 0x23f   :  { %v781_v45 = vmax.f32 %v749_v36, 0.0  ;;  %v700_v26 = vadd.f32 %v1315_v20, %v699_v37 }
 0x240   :  { %v701_v7 = vpop.f32.mrf.mxu1 }
 0x241   :  { %813 = vst [vmem:[#allocation8 + $0xd0] sm:$0xff] %v781_v45  ;;  %v750_v39 = vadd.f32 %v700_v26, %v1222_v29 }
 0x242   :  { %v704_v38 = vpop.f32.mrf.mxu1 }
 0x243   :  { %v782_v41 = vmax.f32 %v750_v39, 0.0  ;;  %v705_v27 = vadd.f32 %v1315_v20, %v704_v38 }
 0x244   :  { %v706_v40 = vpop.f32.mrf.mxu1 }
 0x245   :  { %814 = vst [vmem:[#allocation8 + $0xd8] sm:$0xff] %v782_v41  ;;  %v751_v10 = vadd.f32 %v705_v27, %v1226_v30 }
 0x246   :  { %v709_v48 = vpop.f32.mrf.mxu1 }
 0x247   :  { %v783_v43 = vmax.f32 %v751_v10, 0.0  ;;  %v710_v28 = vadd.f32 %v1315_v20, %v709_v48 }
 0x248   :  { %v711_v0 = vpop.f32.mrf.mxu1 }
 0x249   :  { %815 = vst [vmem:[#allocation8 + $0xe0] sm:$0xff] %v783_v43  ;;  %v752_v44 = vadd.f32 %v710_v28, %v1230_v31 }
 0x24a   :  { %v714_v12 = vpop.f32.mrf.mxu1 }
 0x24b   :  { %v784_v46 = vmax.f32 %v752_v44, 0.0  ;;  %v715_v29 = vadd.f32 %v1315_v20, %v714_v12 }
 0x24c   :  { %v716_v51 = vpop.f32.mrf.mxu1 }
 0x24d   :  { %816 = vst [vmem:[#allocation8 + $0xe8] sm:$0xff] %v784_v46  ;;  %v753_v47 = vadd.f32 %v715_v29, %v1234_v32 }
 0x24e   :  { %v719_v49 = vpop.f32.mrf.mxu1 }
 0x24f   :  { %v785_v14 = vmax.f32 %v753_v47, 0.0  ;;  %v720_v30 = vadd.f32 %v1315_v20, %v719_v49 }
 0x250   :  { %v721_v50 = vpop.f32.mrf.mxu1 }
 0x251   :  { %817 = vst [vmem:[#allocation8 + $0xf0] sm:$0xff] %v785_v14  ;;  %v754_v52 = vadd.f32 %v720_v30, %v1238_v33 }
 0x253   :  { %v786_v54 = vmax.f32 %v754_v52, 0.0 }
 0x255   :  { %818 = vst [vmem:[#allocation8 + $0xf8] sm:$0xff] %v786_v54 }
 0x256   :  { %985 = shalt.err (!%p982_p5)
}
 0x257   :  { %830 = dma.vmem_to_hbm [thread:$0]  %s825_s12, 4096, %s1389_s5, [#allocation4], %s1004_s28, %s1004_s28, %s1005_s29  }
 0x258   :  { %998 = dma.done.wait [#allocation4], 4096  }
 0x259   :  { %999 = vsyncadd [#allocation4], 4294963200 }
 0x25a   :  { %834 = vsyncpa [#allocation3], 1 }
 0x25b   :  { %835 = vsyncpa [#allocation6], 1 }
 0x25c   :  { %836 = vsyncpa [#allocation4], 1 }

</bundles_post_ra>
